<compile_context>
chip_gen: v7x
topology: tpu7x:2x2x1
jax: 0.10.0
libtpu: 0.0.40
codegen_flags: <defaults>
</compile_context>

<pallas_src>
import jax
import jax.numpy as jnp
from jax import lax
from jax.experimental import pallas as pl
from jax.experimental.pallas import tpu as pltpu

LN_EPS = 1e-5
_TK_MAX = 512          # d_hid chunk size (multiple of 256 -> MXU-friendly on v6e/v7x)
_TM_MAX = 512          # max token-row tile


def _round_up(x, m):
    return ((x + m - 1) // m) * m


def _vmem_capacity_bytes():
    try:
        return int(pltpu.get_tpu_info().vmem_capacity_bytes)
    except Exception:
        return 64 * 1024 * 1024  # conservative: v7x per-TensorCore VMEM


def _choose_row_tile(M, tm_max=_TM_MAX):
    """Pick a row tile that is sublane-aligned, limits zero-padding, and gives >=2 grid
    steps once the problem is big enough (so both v7x TensorCores get work)."""
    if M <= 256:
        return _round_up(M, 8)
    if M <= tm_max:
        return _round_up(pl.cdiv(M, 2), 128)
    steps = max(pl.cdiv(M, tm_max), 2)
    return min(_round_up(pl.cdiv(M, steps), 128), tm_max)


def _make_ffn_kernel(tk, n_k):
    """Kernel closure: tk = d_hid chunk width, n_k = number of chunks (trace-time constants)."""

    def _chunk(xc, w1_ref, b1_ref, w2_ref, off):
        # relu(x @ W1[:, off:off+tk] + b1[off:off+tk]) @ W2[off:off+tk, :], f32 accumulation.
        h = jnp.dot(xc, w1_ref[:, pl.ds(off, tk)], preferred_element_type=jnp.float32)
        h = jnp.maximum(h + b1_ref[:, pl.ds(off, tk)].astype(jnp.float32), 0.0)
        return jnp.dot(h.astype(w2_ref.dtype), w2_ref[pl.ds(off, tk), :],
                       preferred_element_type=jnp.float32)

    def kernel(x_ref, w1_ref, b1_ref, w2_ref, b2_ref, gamma_ref, beta_ref, o_ref):
        x = x_ref[...]                         # (tm, d_in), f32 from HBM
        x_f32 = x.astype(jnp.float32)          # residual path stays f32
        xc = x.astype(w1_ref.dtype)            # MXU operand (bf16 by default) — cast in-kernel

        if n_k == 1:
            y = _chunk(xc, w1_ref, b1_ref, w2_ref, 0)
        else:
            def body(k, acc):
                off = pl.multiple_of(k * tk, tk)
                return acc + _chunk(xc, w1_ref, b1_ref, w2_ref, off)
            y = lax.fori_loop(0, n_k, body, jnp.zeros(x.shape, jnp.float32))

        y = y + b2_ref[...].astype(jnp.float32)

        # residual + LayerNorm over last dim, all f32, centered variance (no cancellation).
        z = y + x_f32
        mean = jnp.mean(z, axis=-1, keepdims=True)
        zc = z - mean
        var = jnp.mean(zc * zc, axis=-1, keepdims=True)
        inv = lax.rsqrt(var + LN_EPS)
        out = zc * inv * gamma_ref[...].astype(jnp.float32) + beta_ref[...].astype(jnp.float32)

        o_ref[...] = out.astype(o_ref.dtype)

    return kernel


def prepare_ffn_params(w1, b1, w2, b2, gamma, beta, *, compute_dtype=jnp.bfloat16):
    """One-time parameter prep (transposes / padding / casts hoisted out of the per-call path).

    w1: (d_hid, d_in) conv weight (kernel dim squeezed); w2: (d_in, d_hid); rest 1-D.
    """
    w1 = jnp.asarray(w1)
    w2 = jnp.asarray(w2)
    d_hid, d_in = w1.shape

    # Pad d_hid to a multiple of 256 only when the chunk loop will be used; padded W2 rows are
    # zero, so padded hidden units contribute nothing.
    d_hid_p = d_hid if d_hid <= _TK_MAX else _round_up(d_hid, 256)

    w1t = w1.T                                   # (d_in, d_hid)
    w2t = w2.T                                   # (d_hid, d_in)
    b1v = jnp.asarray(b1, jnp.float32)
    if d_hid_p != d_hid:
        w1t = jnp.pad(w1t, ((0, 0), (0, d_hid_p - d_hid)))
        w2t = jnp.pad(w2t, ((0, d_hid_p - d_hid), (0, 0)))
        b1v = jnp.pad(b1v, (0, d_hid_p - d_hid))
    if compute_dtype is not None:
        w1t = w1t.astype(compute_dtype)
        w2t = w2t.astype(compute_dtype)

    return {
        "w1t": w1t,
        "b1": b1v.reshape(1, d_hid_p),
        "w2t": w2t,
        "b2": jnp.asarray(b2, jnp.float32).reshape(1, d_in),
        "gamma": jnp.asarray(gamma, jnp.float32).reshape(1, d_in),
        "beta": jnp.asarray(beta, jnp.float32).reshape(1, d_in),
    }


def positionwise_ffn(x, params, *, tm_max=_TM_MAX):
    """x: (B, L, d_in) f32/bf16; params from prepare_ffn_params."""
    B, L, d_in = x.shape
    d_hid_p = params["w1t"].shape[1]
    M = B * L

    x2d = x.reshape(M, d_in)                     # no wrapper-side dtype cast (kernel casts operand)

    # Row tile + zero-padding of the token dim so any B*L works (padded rows sliced off).
    tm_eff = _choose_row_tile(M, tm_max)
    M_pad = _round_up(M, tm_eff)
    if M_pad != M:
        x2d = jnp.pad(x2d, ((0, M_pad - M), (0, 0)))
    grid = M_pad // tm_eff

    # d_hid chunking parameters (trace-time constants).
    if d_hid_p <= _TK_MAX:
        tk, n_k = d_hid_p, 1
    else:
        tk = 512 if d_hid_p % 512 == 0 else 256
        n_k = d_hid_p // tk

    # VMEM budget from the actual footprint, capped at (per-core capacity - 16 MiB headroom):
    # ~48 MiB on v7x, ~112 MiB on v5e/v6e.  v5e's scoped default is tiny, so this is mandatory.
    bw = params["w1t"].dtype.itemsize
    bx = x2d.dtype.itemsize
    bo = jnp.dtype(x.dtype).itemsize
    vmem_est = (
        2 * tm_eff * d_in * bx                   # x tile, double-buffered
        + 2 * tm_eff * d_in * bo                 # out tile, double-buffered
        + 2 * d_in * d_hid_p * bw                # W1^T + W2^T resident, single-buffered
        + (d_hid_p + 3 * d_in) * 4               # b1, b2, gamma, beta (f32)
        + tm_eff * d_in * (bw + 4)               # bf16 x operand + f32 accumulator
        + tm_eff * tk * 4                        # live f32 hidden chunk
        + 2 * tm_eff * d_in * 4                  # f32 LayerNorm temporaries
    )
    cap = max(_vmem_capacity_bytes() - 16 * 1024 * 1024, 16 * 1024 * 1024)
    vmem_limit = int(min(max(2 * vmem_est, 16 * 1024 * 1024), cap))

    # Constant-index operands: full tensor, single-buffered (held once in VMEM).
    const_spec = lambda shape: pl.BlockSpec(
        shape, lambda i: (0, 0), pipeline_mode=pl.Buffered(buffer_count=1))

    out2d = pl.pallas_call(
        _make_ffn_kernel(tk, n_k),
        out_shape=jax.ShapeDtypeStruct((M_pad, d_in), x.dtype),
        grid_spec=pltpu.PrefetchScalarGridSpec(
            num_scalar_prefetch=0,
            grid=(grid,),
            in_specs=[
                pl.BlockSpec((tm_eff, d_in), lambda i: (i, 0)),   # x tile (double-buffered)
                const_spec((d_in, d_hid_p)),                      # W1^T
                const_spec((1, d_hid_p)),                         # b1
                const_spec((d_hid_p, d_in)),                      # W2^T
                const_spec((1, d_in)),                            # b2
                const_spec((1, d_in)),                            # gamma
                const_spec((1, d_in)),                            # beta
            ],
            out_specs=pl.BlockSpec((tm_eff, d_in), lambda i: (i, 0)),
        ),
        compiler_params=pltpu.CompilerParams(
            dimension_semantics=("parallel",),
            vmem_limit_bytes=vmem_limit,
        ),
    )(x2d, params["w1t"], params["b1"], params["w2t"], params["b2"],
      params["gamma"], params["beta"])

    return out2d[:M].reshape(B, L, d_in)


def _reference(x, w1, b1, w2, b2, gamma, beta):
    # Pure-JAX reference mirroring the PyTorch forward (eval mode).
    h = jnp.maximum(jnp.einsum("bld,hd->blh", x, w1) + b1, 0.0)
    y = jnp.einsum("blh,dh->bld", h, w2) + b2
    z = y + x
    mean = jnp.mean(z, axis=-1, keepdims=True)
    var = jnp.mean((z - mean) ** 2, axis=-1, keepdims=True)
    return (z - mean) * lax.rsqrt(var + LN_EPS) * gamma + beta


if __name__ == "__main__":
    B, L, d_in, d_hid = 2, 8, 32, 64

    key = jax.random.PRNGKey(0)
    kx, k1, kb1, k2, kb2 = jax.random.split(key, 5)

    x = jax.random.normal(kx, (B, L, d_in), dtype=jnp.float32)
    # Conv1d(d_in, d_hid, 1) weight is (d_hid, d_in, 1) -> squeeze kernel dim.
    w1 = jax.random.normal(k1, (d_hid, d_in), dtype=jnp.float32) * 0.1
    b1 = jax.random.normal(kb1, (d_hid,), dtype=jnp.float32) * 0.1
    w2 = jax.random.normal(k2, (d_in, d_hid), dtype=jnp.float32) * 0.1
    b2 = jax.random.normal(kb2, (d_in,), dtype=jnp.float32) * 0.1
    # nn.LayerNorm default init
    gamma = jnp.ones((d_in,), dtype=jnp.float32)
    beta = jnp.zeros((d_in,), dtype=jnp.float32)

    ref = _reference(x, w1, b1, w2, b2, gamma, beta)

    # f32-weight path: tight check against the f32 reference.
    params_f32 = prepare_ffn_params(w1, b1, w2, b2, gamma, beta, compute_dtype=None)
    out_f32 = jax.block_until_ready(positionwise_ffn(x, params_f32))
    assert out_f32.shape == (B, L, d_in)
    assert jnp.allclose(out_f32, ref, atol=1e-4, rtol=1e-4), "f32 mismatch vs reference"

    # Default bf16-weight path (MXU-rate compute, f32 accumulation/residual/LN): loose check.
    params_bf16 = prepare_ffn_params(w1, b1, w2, b2, gamma, beta)
    out_bf16 = jax.block_until_ready(positionwise_ffn(x, params_bf16))
    assert out_bf16.shape == (B, L, d_in)
    assert jnp.allclose(out_bf16, ref, atol=5e-2, rtol=5e-2), "bf16 mismatch vs reference"

    print("KERNEL_OK")
</pallas_src>

<mosaic_0001>
module attributes {stable_mosaic.version = 11 : i64} {
  func.func @kernel(%arg0: i32, %arg1: memref<16x32xf32, #tpu.memory_space<vmem>>, %arg2: memref<32x64xf32, #tpu.memory_space<vmem>>, %arg3: memref<1x64xf32, #tpu.memory_space<vmem>>, %arg4: memref<64x32xf32, #tpu.memory_space<vmem>>, %arg5: memref<1x32xf32, #tpu.memory_space<vmem>>, %arg6: memref<1x32xf32, #tpu.memory_space<vmem>>, %arg7: memref<1x32xf32, #tpu.memory_space<vmem>>, %arg8: memref<16x32xf32, #tpu.memory_space<vmem>>) attributes {dimension_semantics = [#tpu.dimension_semantics<parallel>], iteration_bounds = array<i64: 1>, scalar_prefetch = 0 : i64, scratch_operands = 0 : i64, tpu.core_type = #tpu.core_type<tc>, window_params = [{transform_indices = @transform_0, window_bounds = array<i64: 16, 32>}, {pipeline_mode = #tpu.pipeline_mode<synchronous>, transform_indices = @transform_1, window_bounds = array<i64: 32, 64>}, {pipeline_mode = #tpu.pipeline_mode<synchronous>, transform_indices = @transform_2, window_bounds = array<i64: 1, 64>}, {pipeline_mode = #tpu.pipeline_mode<synchronous>, transform_indices = @transform_3, window_bounds = array<i64: 64, 32>}, {pipeline_mode = #tpu.pipeline_mode<synchronous>, transform_indices = @transform_4, window_bounds = array<i64: 1, 32>}, {pipeline_mode = #tpu.pipeline_mode<synchronous>, transform_indices = @transform_5, window_bounds = array<i64: 1, 32>}, {pipeline_mode = #tpu.pipeline_mode<synchronous>, transform_indices = @transform_6, window_bounds = array<i64: 1, 32>}, {transform_indices = @transform_7, window_bounds = array<i64: 16, 32>}]} {
    %c0 = arith.constant 0 : index
    %c0_0 = arith.constant 0 : index
    %0 = vector.load %arg1[%c0, %c0_0] : memref<16x32xf32, #tpu.memory_space<vmem>>, vector<16x32xf32>
    %c0_1 = arith.constant 0 : index
    %c0_2 = arith.constant 0 : index
    %1 = vector.load %arg2[%c0_1, %c0_2] : memref<32x64xf32, #tpu.memory_space<vmem>>, vector<32x64xf32>
    %cst = arith.constant dense<0.000000e+00> : vector<16x64xf32>
    %2 = tpu.matmul %0, %1, %cst {dimension_numbers = #tpu.dot_dimension_numbers<[1], [0], [0], [1], [0, 0, 1, 1], [], []>} : vector<16x32xf32>, vector<32x64xf32>, vector<16x64xf32> -> vector<16x64xf32>
    %c0_3 = arith.constant 0 : index
    %c0_4 = arith.constant 0 : index
    %3 = vector.load %arg3[%c0_3, %c0_4] : memref<1x64xf32, #tpu.memory_space<vmem>>, vector<1x64xf32>
    %4 = vector.broadcast %3 : vector<1x64xf32> to vector<16x64xf32>
    %5 = arith.addf %2, %4 : vector<16x64xf32>
    %cst_5 = arith.constant 0.000000e+00 : f32
    %6 = vector.broadcast %cst_5 : f32 to vector<16x64xf32>
    %7 = arith.maximumf %5, %6 : vector<16x64xf32>
    %c0_6 = arith.constant 0 : index
    %c0_7 = arith.constant 0 : index
    %8 = vector.load %arg4[%c0_6, %c0_7] : memref<64x32xf32, #tpu.memory_space<vmem>>, vector<64x32xf32>
    %cst_8 = arith.constant dense<0.000000e+00> : vector<16x32xf32>
    %9 = tpu.matmul %7, %8, %cst_8 {dimension_numbers = #tpu.dot_dimension_numbers<[1], [0], [0], [1], [0, 0, 1, 1], [], []>} : vector<16x64xf32>, vector<64x32xf32>, vector<16x32xf32> -> vector<16x32xf32>
    %c0_9 = arith.constant 0 : index
    %c0_10 = arith.constant 0 : index
    %10 = vector.load %arg5[%c0_9, %c0_10] : memref<1x32xf32, #tpu.memory_space<vmem>>, vector<1x32xf32>
    %11 = vector.broadcast %10 : vector<1x32xf32> to vector<16x32xf32>
    %12 = arith.addf %9, %11 : vector<16x32xf32>
    %13 = arith.addf %12, %0 : vector<16x32xf32>
    %cst_11 = arith.constant dense<0.000000e+00> : vector<16xf32>
    %14 = vector.multi_reduction <add>, %13, %cst_11 [1] : vector<16x32xf32> to vector<16xf32>
    %15 = vector.shape_cast %14 : vector<16xf32> to vector<16x1xf32>
    %cst_12 = arith.constant 3.200000e+01 : f32
    %16 = vector.broadcast %cst_12 : f32 to vector<16x1xf32>
    %17 = arith.divf %15, %16 : vector<16x1xf32>
    %18 = vector.broadcast %17 : vector<16x1xf32> to vector<16x32xf32>
    %19 = arith.subf %13, %18 : vector<16x32xf32>
    %20 = arith.mulf %19, %19 : vector<16x32xf32>
    %cst_13 = arith.constant dense<0.000000e+00> : vector<16xf32>
    %21 = vector.multi_reduction <add>, %20, %cst_13 [1] : vector<16x32xf32> to vector<16xf32>
    %22 = vector.shape_cast %21 : vector<16xf32> to vector<16x1xf32>
    %cst_14 = arith.constant 3.200000e+01 : f32
    %23 = vector.broadcast %cst_14 : f32 to vector<16x1xf32>
    %24 = arith.divf %22, %23 : vector<16x1xf32>
    %cst_15 = arith.constant 9.99999974E-6 : f32
    %25 = vector.broadcast %cst_15 : f32 to vector<16x1xf32>
    %26 = arith.addf %24, %25 : vector<16x1xf32>
    %27 = math.rsqrt %26 : vector<16x1xf32>
    %28 = vector.broadcast %27 : vector<16x1xf32> to vector<16x32xf32>
    %29 = arith.mulf %19, %28 : vector<16x32xf32>
    %c0_16 = arith.constant 0 : index
    %c0_17 = arith.constant 0 : index
    %30 = vector.load %arg6[%c0_16, %c0_17] : memref<1x32xf32, #tpu.memory_space<vmem>>, vector<1x32xf32>
    %31 = vector.broadcast %30 : vector<1x32xf32> to vector<16x32xf32>
    %32 = arith.mulf %29, %31 : vector<16x32xf32>
    %c0_18 = arith.constant 0 : index
    %c0_19 = arith.constant 0 : index
    %33 = vector.load %arg7[%c0_18, %c0_19] : memref<1x32xf32, #tpu.memory_space<vmem>>, vector<1x32xf32>
    %34 = vector.broadcast %33 : vector<1x32xf32> to vector<16x32xf32>
    %35 = arith.addf %32, %34 : vector<16x32xf32>
    %c0_20 = arith.constant 0 : index
    %c0_21 = arith.constant 0 : index
    %36 = vector.load %arg8[%c0_20, %c0_21] : memref<16x32xf32, #tpu.memory_space<vmem>>, vector<16x32xf32>
    tpu.vector_store %arg8[%c0_20, %c0_21], %35 {strides = array<i32>} : memref<16x32xf32, #tpu.memory_space<vmem>>, vector<16x32xf32>,
    return
  }
  func.func @transform_0(%arg0: i32) -> (i32, i32) {
    %c0_i32 = arith.constant 0 : i32
    %c0_i32_0 = arith.constant 0 : i32
    return %arg0, %c0_i32 : i32, i32
  }
  func.func @transform_1(%arg0: i32) -> (i32, i32) {
    %c0_i32 = arith.constant 0 : i32
    %c0_i32_0 = arith.constant 0 : i32
    %c0_i32_1 = arith.constant 0 : i32
    return %c0_i32, %c0_i32_0 : i32, i32
  }
  func.func @transform_2(%arg0: i32) -> (i32, i32) {
    %c0_i32 = arith.constant 0 : i32
    %c0_i32_0 = arith.constant 0 : i32
    %c0_i32_1 = arith.constant 0 : i32
    return %c0_i32, %c0_i32_0 : i32, i32
  }
  func.func @transform_3(%arg0: i32) -> (i32, i32) {
    %c0_i32 = arith.constant 0 : i32
    %c0_i32_0 = arith.constant 0 : i32
    %c0_i32_1 = arith.constant 0 : i32
    return %c0_i32, %c0_i32_0 : i32, i32
  }
  func.func @transform_4(%arg0: i32) -> (i32, i32) {
    %c0_i32 = arith.constant 0 : i32
    %c0_i32_0 = arith.constant 0 : i32
    %c0_i32_1 = arith.constant 0 : i32
    return %c0_i32, %c0_i32_0 : i32, i32
  }
  func.func @transform_5(%arg0: i32) -> (i32, i32) {
    %c0_i32 = arith.constant 0 : i32
    %c0_i32_0 = arith.constant 0 : i32
    %c0_i32_1 = arith.constant 0 : i32
    return %c0_i32, %c0_i32_0 : i32, i32
  }
  func.func @transform_6(%arg0: i32) -> (i32, i32) {
    %c0_i32 = arith.constant 0 : i32
    %c0_i32_0 = arith.constant 0 : i32
    %c0_i32_1 = arith.constant 0 : i32
    return %c0_i32, %c0_i32_0 : i32, i32
  }
  func.func @transform_7(%arg0: i32) -> (i32, i32) {
    %c0_i32 = arith.constant 0 : i32
    %c0_i32_0 = arith.constant 0 : i32
    return %arg0, %c0_i32 : i32, i32
  }
}

</mosaic_0001>

<bundles_post_ra>
// kernel: tpu_custom_call.1
= control target key start
LH: loop header
LB: loop body
LE: loop exit
PB: predicated region body
PF: predicated region fallthrough
CT: control target
= control target key end

     0   :  { %vm40_vm0 = vcmask 261120   ;;  %s512_s0 = inlined_call_operand.vmem [shape: f32[16,32], index: 0, kind: input, shape index: {}]   ;;  %s513_s1 = inlined_call_operand.vmem [shape: f32[32,64], index: 1, kind: input, shape index: {}]   ;;  %s514_s2 = inlined_call_operand.vmem [shape: f32[1,64], index: 2, kind: input, shape index: {}]   ;;  %s515_s3 = inlined_call_operand.vmem [shape: f32[64,32], index: 3, kind: input, shape index: {}]   ;;  %s516_s4 = inlined_call_operand.vmem [shape: f32[1,32], index: 4, kind: input, shape index: {}]   ;;  %s517_s5 = inlined_call_operand.vmem [shape: f32[1,32], index: 5, kind: input, shape index: {}]   ;;  %s518_s6 = inlined_call_operand.vmem [shape: f32[1,32], index: 6, kind: input, shape index: {}]   ;;  %s519_s7 = inlined_call_operand.hbm [shape: f32[16,32], index: 7, kind: output, shape index: {}]  }
   0x1   :  { %v29_v0 = vld [vmem:[%s513_s1] sm:$0xff]  ;;  %v30_v1 = vld [vmem:[%s513_s1 + $0x8] sm:$0xff]  ;;  %v31_v2 = vld [vmem:[%s513_s1 + $0x10] sm:$0xff] }
   0x2   :  { %v340_v3 = vpack.c.bf16 %v30_v1, %v29_v0  ;;  %v32_v4 = vld [vmem:[%s513_s1 + $0x18] sm:$0xff]  ;;  %v27_v5 = vld [vmem:[%s512_s0] sm:$0xff]  ;;  %v125_v8 = vld [vmem:[%s515_s3 + $0x8] sm:$0xff] }
   0x3   :  { %v344_v6 = vpack.c.bf16 %v32_v4, %v31_v2  ;;  %318 = vmatprep.mubr.msk.f32.mxu0 %vm40_vm0, %v27_v5  ;;  %v124_v7 = vld [vmem:[%s515_s3] sm:$0xff]  ;;  %v126_v9 = vld [vmem:[%s515_s3 + $0x10] sm:$0xff]  ;;  %v127_v11 = vld [vmem:[%s515_s3 + $0x18] sm:$0xff] }
   0x4   :  { %341 = vmatprep.subr.bf16.mxu0 %v340_v3  ;;  %v348_v10 = vpack.c.bf16 %v125_v8, %v124_v7  ;;  %v352_v12 = vpack.c.bf16 %v127_v11, %v126_v9  ;;  %v128_v13 = vld [vmem:[%s515_s3 + $0x20] sm:$0xff]  ;;  %v129_v14 = vld [vmem:[%s515_s3 + $0x28] sm:$0xff] }
   0x5   :  { %343 = vmatpush3.bf16.msra.mxu0 %v340_v3 }
   0x6   :  { %12 = vsyncpa [#allocation3], 0  ;;  %345 = vmatprep.subr.bf16.mxu0 %v344_v6  ;;  %349 = vmatprep.subr.bf16.mxu1 %v348_v10  ;;  %v356_v15 = vpack.c.bf16 %v129_v14, %v128_v13  ;;  %v28_v16 = vld [vmem:[%s512_s0 + $0x8] sm:$0xff]  ;;  %v130_v17 = vld [vmem:[%s515_s3 + $0x30] sm:$0xff]  ;;  %vm139_vm1 = vcmask 523264   ;;  %s395_s9 = smov [#allocation2]  }
   0x7   :  { %351 = vmatpush3.bf16.msra.mxu1 %v348_v10  ;;  %v131_v18 = vld [vmem:[%s515_s3 + $0x38] sm:$0xff]  ;;  %v286_v20 = vld [vmem:[%s514_s2] ss:$0 sm:$0xff]  ;;  %s275_s10 = sshll.u32 %s395_s9, 4  ;;  %s276_s10 = int_to_ptr.vmem [resolvable:$true] %s275_s10 }
   0x8   :  { %353 = vmatprep.subr.bf16.mxu1 %v352_v12  ;;  %v360_v19 = vpack.c.bf16 %v131_v18, %v130_v17  ;;  %v289_v27 = vld [vmem:[%s516_s4] ss:$0 sm:$0xff]  ;;  %s371_s11 = scalar_lea.vmem %s276_s10, 256  ;;  %p376_p1 = scmp.lt.s32.totalorder %s276_s10, %s276_s10 }
   0x9   :  { %347 = vmatpush3.bf16.msra.mxu0 %v344_v6  ;;  %v292_v53 = vld [vmem:[%s517_s5] ss:$0 sm:$0xff]  ;;  %p372_p0 = scmp.ne.s32.totalorder %s276_s10, %s371_s11  ;;  %p377_p2 = scmp.lt.s32.totalorder %s371_s11, %s371_s11 }
   0xa   :  { %v293_v55 = vld [vmem:[%s518_s6] ss:$0 sm:$0xff] }
   0xb   :  { %355 = vmatpush3.bf16.msra.mxu1 %v352_v12  ;;  %p378_p3 = por %p377_p2, %p376_p1 }
   0xc   :  { %319 = vmatmul.mubr.msk.f32.vlgmr.msra.gmra.mrb[0].mxu0 %vm40_vm0, %v28_v16  ;;  %357 = vmatprep.subr.bf16.mxu1 %v356_v15 }
   0xd   :  { %p379_p4 = pnand %p378_p3, %p372_p0 }
   0xf   :  { %359 = vmatpush3.bf16.msra.mxu1 %v356_v15 }
  0x10   :  { %361 = vmatprep.subr.bf16.mxu1 %v360_v19 }
  0x13   :  { %363 = vmatpush3.bf16.msra.mxu1 %v360_v19 }
  0xdf   :  { %v320_v21 = vpop.f32.mrb[0].mxu0 }
  0xe0   :  { %v119_v22 = vadd.f32 %v320_v21, %v286_v20  ;;  %v113_v23 = vpop.f32.mrb[1].mxu0 }
  0xe1   :  { %v114_v24 = vadd.f32 %v286_v20, %v113_v23 }
  0xe2   :  { %v123_v26 = vmax.f32 %v119_v22, 0.0 }
  0xe3   :  { %v122_v25 = vmax.f32 %v114_v24, 0.0 }
  0xe5   :  { %337 = vmatprep.mubr.msk.f32.mxu1 %vm139_vm1, %v122_v25 }
  0xe6   :  { %338 = vmatmul.mubr.msk.f32.vlgmr.msra.gmra.mrb[0].mxu1 %vm139_vm1, %v123_v26 }
 0x1b9   :  { %v339_v28 = vpop.f32.mrb[0].mxu1 }
 0x1ba   :  { %v212_v29 = vpop.f32.mrb[1].mxu1  ;;  %v218_v30 = vadd.f32 %v339_v28, %v289_v27 }
 0x1bb   :  { %v213_v31 = vadd.f32 %v289_v27, %v212_v29 }
 0x1bc   :  { %v222_v34 = vadd.f32 %v218_v30, %v28_v16 }
 0x1bd   :  { %v221_v32 = vadd.f32 %v213_v31, %v27_v5 }
 0x1be   :  { %v226_v35 = vsel %vm40_vm0, %v222_v34, 0.0 }
 0x1bf   :  { %v223_v33 = vsel %vm40_vm0, %v221_v32, 0.0 }
 0x1c0   :  { %224 = vadd.xlane.f32.xlu0 %v223_v33 }
 0x1c4   :  { %227 = vadd.xlane.f32.xlu0 %v226_v35 }
 0x24d   :  { %v225_v36 = vpop.xlane.xlu0 %224 }
 0x24e   :  { %v230_v37 = vmul.f32 0.03125, %v225_v36 }
 0x250   :  { %v232_v38 = vsub.f32 %v221_v32, %v230_v37 }
 0x251   :  { %v228_v39 = vpop.xlane.xlu0 %227 }
 0x252   :  { %v231_v40 = vmul.f32 0.03125, %v228_v39  ;;  %v234_v41 = vmul.f32 %v232_v38, %v232_v38 }
 0x254   :  { %v233_v42 = vsub.f32 %v222_v34, %v231_v40  ;;  %v236_v43 = vsel %vm40_vm0, %v234_v41, 0.0 }
 0x255   :  { %237 = vadd.xlane.f32.xlu1 %v236_v43 }
 0x256   :  { %v235_v44 = vmul.f32 %v233_v42, %v233_v42 }
 0x258   :  { %v239_v45 = vsel %vm40_vm0, %v235_v44, 0.0 }
 0x259   :  { %240 = vadd.xlane.f32.xlu1 %v239_v45 }
 0x2e2   :  { %v238_v46 = vpop.xlane.xlu1 %237 }
 0x2e3   :  { %v242_v47 = vmul.f32 0.03125, %v238_v46 }
 0x2e5   :  { %v244_v48 = vadd.f32 1e-05, %v242_v47 }
 0x2e6   :  { %v241_v49 = vpop.xlane.xlu1 %240 }
 0x2e7   :  { %367 = vrsqrt.f32 %v244_v48  ;;  %v243_v50 = vmul.f32 0.03125, %v241_v49 }
 0x2e9   :  { %v245_v51 = vadd.f32 1e-05, %v243_v50 }
 0x2eb   :  { %369 = vrsqrt.f32 %v245_v51 }
 0x2f1   :  { %v368_v52 = vpop.eup %367 }
 0x2f2   :  { %v248_v54 = vmul.f32 %v368_v52, %v232_v38 }
 0x2f4   :  { %v257_v56 = vmul.f32 %v292_v53, %v248_v54 }
 0x2f5   :  { %v370_v57 = vpop.eup %369 }
 0x2f6   :  { %v249_v58 = vmul.f32 %v370_v57, %v233_v42  ;;  %v266_v59 = vadd.f32 %v293_v55, %v257_v56 }
 0x2f8   :  { %v258_v60 = vmul.f32 %v292_v53, %v249_v58  ;;  %268 = vst.msk [vmem:[#allocation2] sm:$0xff] %vm40_vm0, %v266_v59 }
 0x2fa   :  { %v267_v61 = vadd.f32 %v293_v55, %v258_v60 }
 0x2fc   :  { %269 = vst.msk [vmem:[#allocation2 + $0x8] sm:$0xff] %vm40_vm0, %v267_v61 }
 0x2fd   :  { %382 = shalt.err (!%p379_p4)
}
 0x2fe   :  { %s383_s12 = scalar_lea.hbm %s519_s7, 256 }
 0x2ff   :  { %p384_p5 = scmp.ne.s32.totalorder %s519_s7, %s383_s12  ;;  %p387_p6 = scmp.lt.u32.totalorder %s383_s12, %s519_s7 }
 0x301   :  { %p389_p7 = pnand %p387_p6, %p384_p5 }
 0x303   :  { %392 = shalt.err (!%p389_p7)
}
 0x304   :  { %s396_s1 = smov 128   ;;  %s397_s17 = smov 8  }
 0x305   :  { %281 = dma.vmem_to_hbm [thread:$0]  %s276_s10, 256, %s519_s7, [#allocation3], %s396_s1, %s396_s1, %s397_s17  }
 0x306   :  { %393 = dma.done.wait [#allocation3], 256  }
 0x307   :  { %394 = vsyncadd [#allocation3], 4294967040 }
 0x308   :  { %285 = vsyncpa [#allocation3], 1 }

</bundles_post_ra>
